<compile_context>
chip_gen: v7x
topology: tpu7x:2x2x1
jax: 0.10.0
libtpu: 0.0.40
codegen_flags: <defaults>
</compile_context>

<pallas_src>
import functools

import jax
import jax.numpy as jnp
from jax.experimental import pallas as pl
from jax.experimental.pallas import tpu as pltpu


_NORM_EPS = 1e-12   # F.normalize default eps (denominator clamp)
_COS_EPS = 1e-12    # torch cosine_embedding_loss adds this to the *squared* norms


def _round_up(x: int, m: int) -> int:
    return ((x + m - 1) // m) * m


def _cdiv(a: int, b: int) -> int:
    return -(-a // b)


def _squeeze1(x):
    if x.ndim >= 2 and x.shape[1] == 1:
        return jnp.squeeze(x, axis=1)
    return x


def _partials_kernel(a1_ref, a2_ref, b1_ref, b2_ref,          # inputs  (tn, D)
                     dot_ref, na_ref, nb_ref, mse_ref,         # outputs (1, 1, D), resident accumulators
                     *, n_rows, tn, blocks_per_core):
    p = pl.program_id(0)      # row super-block (TensorCore shard on v7x)
    i = pl.program_id(1)      # row block within the shard (reduction axis)

    @pl.when(i == 0)
    def _init():
        dot_ref[...] = jnp.zeros_like(dot_ref)
        na_ref[...] = jnp.zeros_like(na_ref)
        nb_ref[...] = jnp.zeros_like(nb_ref)
        mse_ref[...] = jnp.zeros_like(mse_ref)

    # Mask rows past n_rows (ragged tail / over-run blocks) instead of padding in HBM.
    row0 = (p * blocks_per_core + i) * tn
    row_ids = row0 + jax.lax.broadcasted_iota(jnp.int32, (tn, 1), 0)
    valid = row_ids < n_rows

    # diff_img / diff_unclip for this row block (upcast to f32 as the module does).
    a = jnp.where(valid,
                  a1_ref[...].astype(jnp.float32) - a2_ref[...].astype(jnp.float32),
                  0.0)
    b = jnp.where(valid,
                  b1_ref[...].astype(jnp.float32) - b2_ref[...].astype(jnp.float32),
                  0.0)

    asq = a * a
    bsq = b * b
    ab = a * b

    # Row-wise L2 normalization (F.normalize, dim=1): narrow (tn, 1) rsqrt on the
    # EUP; the factors are folded into the column accumulations below, so the hot
    # path is pure VPU multiplies and no normalized full-tile intermediates are kept.
    ss_a = jnp.sum(asq, axis=1, keepdims=True)
    ss_b = jnp.sum(bsq, axis=1, keepdims=True)
    inv_a = jax.lax.rsqrt(jnp.maximum(ss_a, _NORM_EPS * _NORM_EPS))   # == 1/max(|a|, eps)
    inv_b = jax.lax.rsqrt(jnp.maximum(ss_b, _NORM_EPS * _NORM_EPS))

    diff = a - b

    # Column partial sums for this block, accumulated into the resident outputs.
    dot_ref[0] += jnp.sum(ab * (inv_a * inv_b), axis=0, keepdims=True)
    na_ref[0] += jnp.sum(asq * (inv_a * inv_a), axis=0, keepdims=True)
    nb_ref[0] += jnp.sum(bsq * (inv_b * inv_b), axis=0, keepdims=True)
    mse_ref[0] += jnp.sum(diff * diff, axis=0, keepdims=True)


def combined_loss(init_img_vec, next_img_vec, init_unclip, pred_unclip, *,
                  weight_rote=0.5, weight_mse=0.5, cos_way=-1, dim_norm=1,
                  eps=1e-08, block_rows=None):
    if cos_way not in (1, -1):
        raise ValueError("cos_way must be 1 or -1")
    if dim_norm != 1:
        # TODO(synk): dim_norm != 1 (column-wise F.normalize) not implemented.
        raise NotImplementedError("only dim_norm=1 is supported")

    a1, a2, b1, b2 = map(_squeeze1, (init_img_vec, next_img_vec, init_unclip, pred_unclip))
    n, d = a1.shape
    itemsize = max(jnp.dtype(x.dtype).itemsize for x in (a1, a2, b1, b2))

    # Explicit, generation-aware scoped-VMEM budget.  Clamp the request into a
    # range that is safe on every generation (v7x has only 64 MiB per TensorCore)
    # while staying well above the 16/32 MiB defaults so row blocks can be large.
    try:
        vmem_cap = int(pltpu.get_tpu_info().vmem_capacity_bytes)
    except Exception:
        vmem_cap = 64 * 1024 * 1024            # conservative (v7x-sized) fallback
    vmem_limit = max(32 << 20, min(vmem_cap * 3 // 4, 48 << 20))
    in_budget = vmem_limit // 2                # half for the double-buffered inputs

    # Row sharding: a leading "parallel" axis of 2 row super-blocks lets a v7x
    # chip use both TensorCores; on single-core v5e/v6e it only splits the
    # sequential loop in two (negligible cost).
    n8 = _round_up(n, 8)
    num_cores = 2 if n8 >= 16 else 1
    rows_per_core = _round_up(_cdiv(n8, num_cores), 8)

    # Row-block size from the VMEM budget (4 inputs, double-buffered), multiple of 8.
    bytes_per_row = 4 * d * itemsize * 2
    tn = max(8, (in_budget // bytes_per_row) // 8 * 8)
    if block_rows is not None:
        tn = max(8, _round_up(int(block_rows), 8))
    tn = min(tn, rows_per_core)
    blocks_per_core = _cdiv(rows_per_core, tn)

    # Guard the pathological huge-D case where even the minimum tile overflows
    # the budget: raise the limit toward what is actually needed (capped near physical).
    needed = 4 * 2 * tn * d * itemsize + (4 << 20)
    vmem_limit = max(vmem_limit, min(needed, vmem_cap * 9 // 10))

    last_blk = _cdiv(n, tn) - 1

    def in_map(p, i):
        # Clamp so a fully out-of-range tail block re-reads the last valid block
        # (its rows are masked out in the kernel anyway).
        return (jnp.minimum(p * blocks_per_core + i, last_blk), 0)

    # Full-D blocks: no lane padding and no wrapper-side jnp.pad copies.
    in_spec = pl.BlockSpec((tn, d), in_map)
    # Per-shard resident accumulator block; last dim is the full (lane-dense) D.
    out_spec = pl.BlockSpec((1, 1, d), lambda p, i: (p, 0, 0))
    out_shape = jax.ShapeDtypeStruct((num_cores, 1, d), jnp.float32)

    kernel = functools.partial(_partials_kernel, n_rows=n, tn=tn,
                               blocks_per_core=blocks_per_core)

    cost = pl.CostEstimate(
        flops=16 * n * d,
        transcendentals=2 * n,
        bytes_accessed=4 * n * d * itemsize + 4 * num_cores * d * 4)

    dot_p, na_p, nb_p, mse_p = pl.pallas_call(
        kernel,
        out_shape=(out_shape, out_shape, out_shape, out_shape),
        grid_spec=pltpu.PrefetchScalarGridSpec(
            num_scalar_prefetch=0,
            grid=(num_cores, blocks_per_core),
            in_specs=[in_spec, in_spec, in_spec, in_spec],
            out_specs=(out_spec, out_spec, out_spec, out_spec),
        ),
        compiler_params=pltpu.CompilerParams(
            dimension_semantics=("parallel", "arbitrary"),
            vmem_limit_bytes=int(vmem_limit)),
        cost_estimate=cost,
    )(a1, a2, b1, b2)

    # Tiny O(D) epilogue in plain JAX: combine the per-shard partial sums and
    # apply the cos/mse finalization, nan_to_num, eps and loss weights.
    dot = jnp.sum(dot_p, axis=(0, 1))
    na = jnp.sum(na_p, axis=(0, 1)) + _COS_EPS
    nb = jnp.sum(nb_p, axis=(0, 1)) + _COS_EPS
    mse_sum = jnp.sum(mse_p, axis=(0, 1))

    cos = dot / jnp.sqrt(na * nb)
    cos_l = cos if cos_way == 1 else jnp.maximum(cos, 0.0)   # margin = 0
    mse = mse_sum * jnp.float32(1.0 / n)
    cos_l = jnp.nan_to_num(cos_l, nan=0.0, posinf=1e6, neginf=-1e6) + eps
    mse = jnp.nan_to_num(mse, nan=0.0, posinf=1e6, neginf=-1e6) + eps
    return weight_rote * cos_l, weight_mse * mse


def combined_loss_ref(init_img_vec, next_img_vec, init_unclip, pred_unclip, *,
                      weight_rote=0.5, weight_mse=0.5, cos_way=-1, dim_norm=1, eps=1e-08):
    """Pure-JAX reference mirroring the PyTorch forward."""
    a1, a2, b1, b2 = map(_squeeze1, (init_img_vec, next_img_vec, init_unclip, pred_unclip))
    diff_img = (a1 - a2).astype(jnp.float32)
    diff_unclip = b1.astype(jnp.float32) - b2

    def l2norm(x):
        nrm = jnp.sqrt(jnp.sum(x * x, axis=dim_norm, keepdims=True))
        return x / jnp.maximum(nrm, _NORM_EPS)

    an, bn = l2norm(diff_img), l2norm(diff_unclip)
    dot = jnp.sum(an * bn, axis=0)
    na = jnp.sum(an * an, axis=0) + _COS_EPS
    nb = jnp.sum(bn * bn, axis=0) + _COS_EPS
    cos = dot / jnp.sqrt(na * nb)
    cos_l = cos if cos_way == 1 else jnp.maximum(cos, 0.0)
    mse = jnp.mean((diff_img - diff_unclip) ** 2, axis=0)
    cos_l = jnp.nan_to_num(cos_l, nan=0.0, posinf=1e6, neginf=-1e6) + eps
    mse = jnp.nan_to_num(mse, nan=0.0, posinf=1e6, neginf=-1e6) + eps
    return weight_rote * cos_l, weight_mse * mse


if __name__ == "__main__":
    # Small shapes consistent with the module: a batch of 24 embedding vectors of
    # width 256 in the (N, 1, D) layout implied by the squeeze(dim=1)s.
    N, D = 24, 256
    key = jax.random.PRNGKey(0)
    k1, k2, k3, k4 = jax.random.split(key, 4)
    init_img_vec = jax.random.normal(k1, (N, 1, D), dtype=jnp.float32)
    next_img_vec = jax.random.normal(k2, (N, 1, D), dtype=jnp.float32)
    init_unclip = jax.random.normal(k3, (N, 1, D), dtype=jnp.float32)
    pred_unclip = jax.random.normal(k4, (N, 1, D), dtype=jnp.float32)

    cos_ref, mse_ref = combined_loss_ref(init_img_vec, next_img_vec,
                                         init_unclip, pred_unclip)

    # Auto-tiled path (one row block per core shard).
    cos_l, mse_l = jax.jit(combined_loss)(init_img_vec, next_img_vec,
                                          init_unclip, pred_unclip)
    cos_l, mse_l = jax.block_until_ready((cos_l, mse_l))
    assert cos_l.shape == (D,) and mse_l.shape == (D,)
    assert jnp.allclose(cos_l, cos_ref, rtol=1e-4, atol=1e-6), (cos_l, cos_ref)
    assert jnp.allclose(mse_l, mse_ref, rtol=1e-4, atol=1e-6), (mse_l, mse_ref)

    # Small forced row blocks: exercises multi-step accumulation, the ragged-row
    # mask and the clamped over-run block on the tail shard.
    cos_s, mse_s = jax.jit(functools.partial(combined_loss, block_rows=8))(
        init_img_vec, next_img_vec, init_unclip, pred_unclip)
    cos_s, mse_s = jax.block_until_ready((cos_s, mse_s))
    assert jnp.allclose(cos_s, cos_ref, rtol=1e-4, atol=1e-6), (cos_s, cos_ref)
    assert jnp.allclose(mse_s, mse_ref, rtol=1e-4, atol=1e-6), (mse_s, mse_ref)

    print("KERNEL_OK")
</pallas_src>

<mosaic_0001>
module attributes {stable_mosaic.version = 11 : i64} {
  func.func @_partials_kernel(%arg0: i32, %arg1: i32, %arg2: memref<16x256xf32, #tpu.memory_space<vmem>>, %arg3: memref<16x256xf32, #tpu.memory_space<vmem>>, %arg4: memref<16x256xf32, #tpu.memory_space<vmem>>, %arg5: memref<16x256xf32, #tpu.memory_space<vmem>>, %arg6: memref<1x1x256xf32, #tpu.memory_space<vmem>>, %arg7: memref<1x1x256xf32, #tpu.memory_space<vmem>>, %arg8: memref<1x1x256xf32, #tpu.memory_space<vmem>>, %arg9: memref<1x1x256xf32, #tpu.memory_space<vmem>>) attributes {dimension_semantics = [#tpu.dimension_semantics<parallel>, #tpu.dimension_semantics<arbitrary>], iteration_bounds = array<i64: 2, 1>, scalar_prefetch = 0 : i64, scratch_operands = 0 : i64, tpu.core_type = #tpu.core_type<tc>, window_params = [{transform_indices = @transform_0, window_bounds = array<i64: 16, 256>}, {transform_indices = @transform_1, window_bounds = array<i64: 16, 256>}, {transform_indices = @transform_2, window_bounds = array<i64: 16, 256>}, {transform_indices = @transform_3, window_bounds = array<i64: 16, 256>}, {transform_indices = @transform_4, window_bounds = array<i64: 1, 1, 256>}, {transform_indices = @transform_5, window_bounds = array<i64: 1, 1, 256>}, {transform_indices = @transform_6, window_bounds = array<i64: 1, 1, 256>}, {transform_indices = @transform_7, window_bounds = array<i64: 1, 1, 256>}]} {
    %c0_i32 = arith.constant 0 : i32
    %0 = arith.cmpi eq, %arg1, %c0_i32 : i32
    %1 = arith.extui %0 : i1 to i32
    %c0_i32_0 = arith.constant 0 : i32
    %2 = arith.cmpi ne, %1, %c0_i32_0 : i32
    scf.if %2 {
      %cst_41 = arith.constant 0.000000e+00 : f32
      %81 = vector.broadcast %cst_41 : f32 to vector<1x1x256xf32>
      %c0_42 = arith.constant 0 : index
      %c0_43 = arith.constant 0 : index
      %c0_44 = arith.constant 0 : index
      %82 = vector.load %arg6[%c0_42, %c0_43, %c0_44] : memref<1x1x256xf32, #tpu.memory_space<vmem>>, vector<1x1x256xf32>
      tpu.vector_store %arg6[%c0_42, %c0_43, %c0_44], %81 {strides = array<i32>} : memref<1x1x256xf32, #tpu.memory_space<vmem>>, vector<1x1x256xf32>,
      %cst_45 = arith.constant 0.000000e+00 : f32
      %83 = vector.broadcast %cst_45 : f32 to vector<1x1x256xf32>
      %c0_46 = arith.constant 0 : index
      %c0_47 = arith.constant 0 : index
      %c0_48 = arith.constant 0 : index
      %84 = vector.load %arg7[%c0_46, %c0_47, %c0_48] : memref<1x1x256xf32, #tpu.memory_space<vmem>>, vector<1x1x256xf32>
      tpu.vector_store %arg7[%c0_46, %c0_47, %c0_48], %83 {strides = array<i32>} : memref<1x1x256xf32, #tpu.memory_space<vmem>>, vector<1x1x256xf32>,
      %cst_49 = arith.constant 0.000000e+00 : f32
      %85 = vector.broadcast %cst_49 : f32 to vector<1x1x256xf32>
      %c0_50 = arith.constant 0 : index
      %c0_51 = arith.constant 0 : index
      %c0_52 = arith.constant 0 : index
      %86 = vector.load %arg8[%c0_50, %c0_51, %c0_52] : memref<1x1x256xf32, #tpu.memory_space<vmem>>, vector<1x1x256xf32>
      tpu.vector_store %arg8[%c0_50, %c0_51, %c0_52], %85 {strides = array<i32>} : memref<1x1x256xf32, #tpu.memory_space<vmem>>, vector<1x1x256xf32>,
      %cst_53 = arith.constant 0.000000e+00 : f32
      %87 = vector.broadcast %cst_53 : f32 to vector<1x1x256xf32>
      %c0_54 = arith.constant 0 : index
      %c0_55 = arith.constant 0 : index
      %c0_56 = arith.constant 0 : index
      %88 = vector.load %arg9[%c0_54, %c0_55, %c0_56] : memref<1x1x256xf32, #tpu.memory_space<vmem>>, vector<1x1x256xf32>
      tpu.vector_store %arg9[%c0_54, %c0_55, %c0_56], %87 {strides = array<i32>} : memref<1x1x256xf32, #tpu.memory_space<vmem>>, vector<1x1x256xf32>,
    } else {
    }
    %c1_i32 = arith.constant 1 : i32
    %3 = arith.muli %arg0, %c1_i32 : i32
    %4 = arith.addi %3, %arg1 : i32
    %c16_i32 = arith.constant 16 : i32
    %5 = arith.muli %4, %c16_i32 : i32
    %6 = tpu.iota {dimensions = array<i32: 0>} : vector<16x1xi32>
    %7 = vector.broadcast %5 : i32 to vector<16x1xi32>
    %8 = arith.addi %7, %6 : vector<16x1xi32>
    %c24_i32 = arith.constant 24 : i32
    %9 = vector.broadcast %c24_i32 : i32 to vector<16x1xi32>
    %10 = arith.cmpi slt, %8, %9 : vector<16x1xi32>
    %c0 = arith.constant 0 : index
    %c0_1 = arith.constant 0 : index
    %11 = vector.load %arg2[%c0, %c0_1] : memref<16x256xf32, #tpu.memory_space<vmem>>, vector<16x256xf32>
    %c0_2 = arith.constant 0 : index
    %c0_3 = arith.constant 0 : index
    %12 = vector.load %arg3[%c0_2, %c0_3] : memref<16x256xf32, #tpu.memory_space<vmem>>, vector<16x256xf32>
    %13 = arith.subf %11, %12 : vector<16x256xf32>
    %cst = arith.constant 0.000000e+00 : f32
    %14 = vector.shape_cast %10 : vector<16x1xi1> to vector<16x1xi1>
    %15 = vector.broadcast %14 : vector<16x1xi1> to vector<16x256xi1>
    %16 = vector.broadcast %cst : f32 to vector<16x256xf32>
    %17 = arith.select %15, %13, %16 : vector<16x256xi1>, vector<16x256xf32>
    %c0_4 = arith.constant 0 : index
    %c0_5 = arith.constant 0 : index
    %18 = vector.load %arg4[%c0_4, %c0_5] : memref<16x256xf32, #tpu.memory_space<vmem>>, vector<16x256xf32>
    %c0_6 = arith.constant 0 : index
    %c0_7 = arith.constant 0 : index
    %19 = vector.load %arg5[%c0_6, %c0_7] : memref<16x256xf32, #tpu.memory_space<vmem>>, vector<16x256xf32>
    %20 = arith.subf %18, %19 : vector<16x256xf32>
    %cst_8 = arith.constant 0.000000e+00 : f32
    %21 = vector.shape_cast %10 : vector<16x1xi1> to vector<16x1xi1>
    %22 = vector.broadcast %21 : vector<16x1xi1> to vector<16x256xi1>
    %23 = vector.broadcast %cst_8 : f32 to vector<16x256xf32>
    %24 = arith.select %22, %20, %23 : vector<16x256xi1>, vector<16x256xf32>
    %25 = arith.mulf %17, %17 : vector<16x256xf32>
    %26 = arith.mulf %24, %24 : vector<16x256xf32>
    %27 = arith.mulf %17, %24 : vector<16x256xf32>
    %cst_9 = arith.constant dense<0.000000e+00> : vector<16xf32>
    %28 = vector.multi_reduction <add>, %25, %cst_9 [1] : vector<16x256xf32> to vector<16xf32>
    %29 = vector.shape_cast %28 : vector<16xf32> to vector<16x1xf32>
    %cst_10 = arith.constant dense<0.000000e+00> : vector<16xf32>
    %30 = vector.multi_reduction <add>, %26, %cst_10 [1] : vector<16x256xf32> to vector<16xf32>
    %31 = vector.shape_cast %30 : vector<16xf32> to vector<16x1xf32>
    %cst_11 = arith.constant 1.000000e-24 : f32
    %32 = vector.broadcast %cst_11 : f32 to vector<16x1xf32>
    %33 = arith.maximumf %29, %32 : vector<16x1xf32>
    %34 = math.rsqrt %33 : vector<16x1xf32>
    %cst_12 = arith.constant 1.000000e-24 : f32
    %35 = vector.broadcast %cst_12 : f32 to vector<16x1xf32>
    %36 = arith.maximumf %31, %35 : vector<16x1xf32>
    %37 = math.rsqrt %36 : vector<16x1xf32>
    %38 = arith.subf %17, %24 : vector<16x256xf32>
    %c0_13 = arith.constant 0 : index
    %c0_14 = arith.constant 0 : index
    %c0_15 = arith.constant 0 : index
    %39 = vector.load %arg6[%c0_13, %c0_14, %c0_15] : memref<1x1x256xf32, #tpu.memory_space<vmem>>, vector<1x1x256xf32>
    %40 = vector.shape_cast %39 : vector<1x1x256xf32> to vector<1x256xf32>
    %41 = arith.mulf %34, %37 : vector<16x1xf32>
    %42 = vector.broadcast %41 : vector<16x1xf32> to vector<16x256xf32>
    %43 = arith.mulf %27, %42 : vector<16x256xf32>
    %cst_16 = arith.constant dense<0.000000e+00> : vector<256xf32>
    %44 = vector.multi_reduction <add>, %43, %cst_16 [0] : vector<16x256xf32> to vector<256xf32>
    %45 = vector.shape_cast %44 : vector<256xf32> to vector<1x256xf32>
    %46 = arith.addf %40, %45 : vector<1x256xf32>
    %c0_17 = arith.constant 0 : index
    %c0_18 = arith.constant 0 : index
    %c0_19 = arith.constant 0 : index
    %47 = vector.load %arg6[%c0_17, %c0_18, %c0_19] : memref<1x1x256xf32, #tpu.memory_space<vmem>>, vector<1x1x256xf32>
    %48 = vector.shape_cast %47 : vector<1x1x256xf32> to vector<1x256xf32>
    %49 = vector.shape_cast %46 : vector<1x256xf32> to vector<1x1x256xf32>
    tpu.vector_store %arg6[%c0_17, %c0_18, %c0_19], %49 {strides = array<i32>} : memref<1x1x256xf32, #tpu.memory_space<vmem>>, vector<1x1x256xf32>,
    %c0_20 = arith.constant 0 : index
    %c0_21 = arith.constant 0 : index
    %c0_22 = arith.constant 0 : index
    %50 = vector.load %arg7[%c0_20, %c0_21, %c0_22] : memref<1x1x256xf32, #tpu.memory_space<vmem>>, vector<1x1x256xf32>
    %51 = vector.shape_cast %50 : vector<1x1x256xf32> to vector<1x256xf32>
    %52 = arith.mulf %34, %34 : vector<16x1xf32>
    %53 = vector.broadcast %52 : vector<16x1xf32> to vector<16x256xf32>
    %54 = arith.mulf %25, %53 : vector<16x256xf32>
    %cst_23 = arith.constant dense<0.000000e+00> : vector<256xf32>
    %55 = vector.multi_reduction <add>, %54, %cst_23 [0] : vector<16x256xf32> to vector<256xf32>
    %56 = vector.shape_cast %55 : vector<256xf32> to vector<1x256xf32>
    %57 = arith.addf %51, %56 : vector<1x256xf32>
    %c0_24 = arith.constant 0 : index
    %c0_25 = arith.constant 0 : index
    %c0_26 = arith.constant 0 : index
    %58 = vector.load %arg7[%c0_24, %c0_25, %c0_26] : memref<1x1x256xf32, #tpu.memory_space<vmem>>, vector<1x1x256xf32>
    %59 = vector.shape_cast %58 : vector<1x1x256xf32> to vector<1x256xf32>
    %60 = vector.shape_cast %57 : vector<1x256xf32> to vector<1x1x256xf32>
    tpu.vector_store %arg7[%c0_24, %c0_25, %c0_26], %60 {strides = array<i32>} : memref<1x1x256xf32, #tpu.memory_space<vmem>>, vector<1x1x256xf32>,
    %c0_27 = arith.constant 0 : index
    %c0_28 = arith.constant 0 : index
    %c0_29 = arith.constant 0 : index
    %61 = vector.load %arg8[%c0_27, %c0_28, %c0_29] : memref<1x1x256xf32, #tpu.memory_space<vmem>>, vector<1x1x256xf32>
    %62 = vector.shape_cast %61 : vector<1x1x256xf32> to vector<1x256xf32>
    %63 = arith.mulf %37, %37 : vector<16x1xf32>
    %64 = vector.broadcast %63 : vector<16x1xf32> to vector<16x256xf32>
    %65 = arith.mulf %26, %64 : vector<16x256xf32>
    %cst_30 = arith.constant dense<0.000000e+00> : vector<256xf32>
    %66 = vector.multi_reduction <add>, %65, %cst_30 [0] : vector<16x256xf32> to vector<256xf32>
    %67 = vector.shape_cast %66 : vector<256xf32> to vector<1x256xf32>
    %68 = arith.addf %62, %67 : vector<1x256xf32>
    %c0_31 = arith.constant 0 : index
    %c0_32 = arith.constant 0 : index
    %c0_33 = arith.constant 0 : index
    %69 = vector.load %arg8[%c0_31, %c0_32, %c0_33] : memref<1x1x256xf32, #tpu.memory_space<vmem>>, vector<1x1x256xf32>
    %70 = vector.shape_cast %69 : vector<1x1x256xf32> to vector<1x256xf32>
    %71 = vector.shape_cast %68 : vector<1x256xf32> to vector<1x1x256xf32>
    tpu.vector_store %arg8[%c0_31, %c0_32, %c0_33], %71 {strides = array<i32>} : memref<1x1x256xf32, #tpu.memory_space<vmem>>, vector<1x1x256xf32>,
    %c0_34 = arith.constant 0 : index
    %c0_35 = arith.constant 0 : index
    %c0_36 = arith.constant 0 : index
    %72 = vector.load %arg9[%c0_34, %c0_35, %c0_36] : memref<1x1x256xf32, #tpu.memory_space<vmem>>, vector<1x1x256xf32>
    %73 = vector.shape_cast %72 : vector<1x1x256xf32> to vector<1x256xf32>
    %74 = arith.mulf %38, %38 : vector<16x256xf32>
    %cst_37 = arith.constant dense<0.000000e+00> : vector<256xf32>
    %75 = vector.multi_reduction <add>, %74, %cst_37 [0] : vector<16x256xf32> to vector<256xf32>
    %76 = vector.shape_cast %75 : vector<256xf32> to vector<1x256xf32>
    %77 = arith.addf %73, %76 : vector<1x256xf32>
    %c0_38 = arith.constant 0 : index
    %c0_39 = arith.constant 0 : index
    %c0_40 = arith.constant 0 : index
    %78 = vector.load %arg9[%c0_38, %c0_39, %c0_40] : memref<1x1x256xf32, #tpu.memory_space<vmem>>, vector<1x1x256xf32>
    %79 = vector.shape_cast %78 : vector<1x1x256xf32> to vector<1x256xf32>
    %80 = vector.shape_cast %77 : vector<1x256xf32> to vector<1x1x256xf32>
    tpu.vector_store %arg9[%c0_38, %c0_39, %c0_40], %80 {strides = array<i32>} : memref<1x1x256xf32, #tpu.memory_space<vmem>>, vector<1x1x256xf32>,
    return
  }
  func.func @transform_0(%arg0: i32, %arg1: i32) -> (i32, i32) {
    %c1_i32 = arith.constant 1 : i32
    %0 = arith.muli %arg0, %c1_i32 : i32
    %1 = arith.addi %0, %arg1 : i32
    %c1_i32_0 = arith.constant 1 : i32
    %2 = arith.minsi %1, %c1_i32_0 : i32
    %c0_i32 = arith.constant 0 : i32
    %c0_i32_1 = arith.constant 0 : i32
    return %2, %c0_i32 : i32, i32
  }
  func.func @transform_1(%arg0: i32, %arg1: i32) -> (i32, i32) {
    %c1_i32 = arith.constant 1 : i32
    %0 = arith.muli %arg0, %c1_i32 : i32
    %1 = arith.addi %0, %arg1 : i32
    %c1_i32_0 = arith.constant 1 : i32
    %2 = arith.minsi %1, %c1_i32_0 : i32
    %c0_i32 = arith.constant 0 : i32
    %c0_i32_1 = arith.constant 0 : i32
    return %2, %c0_i32 : i32, i32
  }
  func.func @transform_2(%arg0: i32, %arg1: i32) -> (i32, i32) {
    %c1_i32 = arith.constant 1 : i32
    %0 = arith.muli %arg0, %c1_i32 : i32
    %1 = arith.addi %0, %arg1 : i32
    %c1_i32_0 = arith.constant 1 : i32
    %2 = arith.minsi %1, %c1_i32_0 : i32
    %c0_i32 = arith.constant 0 : i32
    %c0_i32_1 = arith.constant 0 : i32
    return %2, %c0_i32 : i32, i32
  }
  func.func @transform_3(%arg0: i32, %arg1: i32) -> (i32, i32) {
    %c1_i32 = arith.constant 1 : i32
    %0 = arith.muli %arg0, %c1_i32 : i32
    %1 = arith.addi %0, %arg1 : i32
    %c1_i32_0 = arith.constant 1 : i32
    %2 = arith.minsi %1, %c1_i32_0 : i32
    %c0_i32 = arith.constant 0 : i32
    %c0_i32_1 = arith.constant 0 : i32
    return %2, %c0_i32 : i32, i32
  }
  func.func @transform_4(%arg0: i32, %arg1: i32) -> (i32, i32, i32) {
    %c0_i32 = arith.constant 0 : i32
    %c0_i32_0 = arith.constant 0 : i32
    %c0_i32_1 = arith.constant 0 : i32
    return %arg0, %c0_i32, %c0_i32_0 : i32, i32, i32
  }
  func.func @transform_5(%arg0: i32, %arg1: i32) -> (i32, i32, i32) {
    %c0_i32 = arith.constant 0 : i32
    %c0_i32_0 = arith.constant 0 : i32
    %c0_i32_1 = arith.constant 0 : i32
    return %arg0, %c0_i32, %c0_i32_0 : i32, i32, i32
  }
  func.func @transform_6(%arg0: i32, %arg1: i32) -> (i32, i32, i32) {
    %c0_i32 = arith.constant 0 : i32
    %c0_i32_0 = arith.constant 0 : i32
    %c0_i32_1 = arith.constant 0 : i32
    return %arg0, %c0_i32, %c0_i32_0 : i32, i32, i32
  }
  func.func @transform_7(%arg0: i32, %arg1: i32) -> (i32, i32, i32) {
    %c0_i32 = arith.constant 0 : i32
    %c0_i32_0 = arith.constant 0 : i32
    %c0_i32_1 = arith.constant 0 : i32
    return %arg0, %c0_i32, %c0_i32_0 : i32, i32, i32
  }
}

</mosaic_0001>

<bundles_post_ra>
// kernel: combined_loss.1
= control target key start
LH: loop header
LB: loop body
LE: loop exit
PB: predicated region body
PF: predicated region fallthrough
CT: control target
= control target key end

     0   :  { %s1162_s24 = smov 0   ;;  %s1164_s25 = smov 0   ;;  %s1332_s0 = inlined_call_operand.vmem [shape: f32[24,256], index: 0, kind: input, shape index: {}]   ;;  %s1333_s1 = inlined_call_operand.vmem [shape: f32[24,256], index: 1, kind: input, shape index: {}]   ;;  %s1334_s2 = inlined_call_operand.vmem [shape: f32[24,256], index: 2, kind: input, shape index: {}]   ;;  %s1335_s3 = inlined_call_operand.vmem [shape: f32[24,256], index: 3, kind: input, shape index: {}]   ;;  %s1336_s4 = inlined_call_operand.vmem [shape: f32[2,1,256], index: 4, kind: output, shape index: {0}]   ;;  %s1337_s5 = inlined_call_operand.vmem [shape: f32[2,1,256], index: 5, kind: output, shape index: {1}]   ;;  %s1338_s6 = inlined_call_operand.vmem [shape: f32[2,1,256], index: 6, kind: output, shape index: {2}]   ;;  %s1339_s7 = inlined_call_operand.vmem [shape: f32[2,1,256], index: 7, kind: output, shape index: {3}]  }
   0x1   :  { %s1166_s26 = smov 0  }
   0x2 LB: > { %s30_s27 = sadd.s32 1, %s1114_s25  ;;  %p1038_p0 = scmp.ge.s32.totalorder %s1118_s26, 1  ;;  %s1118_s26 = sphi %s1166_s26, %s18_s26   ;;  %s1114_s25 = sphi %s1164_s25, %s1343_s25   ;;  %s1110_s24 = sphi %s1162_s24, %s1342_s24  }
   0x3   : > { %p32_p1 = scmp.ge.s32.totalorder %s30_s27, 2  ;;  %p382_p2 = scmp.lt.s32.totalorder %s1118_s26, 3 }
   0x5   : > { %s1345_s27 = smov (%p32_p1, %s30_s27), 0  ;;  %p383_p3 = pnand %p1038_p0, %p382_p2 }
   0x6   : > { %p477_p4 = scmp.lt.s32.totalorder (!%p383_p3), %s1110_s24, 1  ;;  %v588_v0 = vlaneseq (!%p383_p3)  ;;  %s1055_s28 = sshll.u32 (!%p383_p3), %s1110_s24, 4  ;;  %v1120_v5 = vmov (!%p383_p3), 0.0  }
   0x7   : > { %386 = sbr.rel (%p383_p3) target bundleno = 221 (0xdd), region = 36  ;;  %v601_v3 = vstv (!%p383_p3), %s1055_s28 }
   0x8   : > { %vm1180_vm0 = vcmp.lt.s32.totalorder (!%p383_p3), %v588_v0, 256  ;;  %v1184_v2 = vshrl.u32 (!%p383_p3), %v588_v0, 7 }
   0xa   : > { %v600_v4 = vadd.s32 (!%p383_p3), 8, %v1184_v2  ;;  %v602_v6 = vadd.s32 (!%p383_p3), %v601_v3, %v1184_v2 }
   0xc   : > { %v603_v7 = vadd.s32 (!%p383_p3), %v601_v3, %v600_v4  ;;  %vm604_vm1 = vcmp.lt.s32.totalorder (!%p383_p3), %v602_v6, 24 }
   0xe   : > { %s1347_s24 = smov (!%p477_p4, %s1110_s24), 1  ;;  %vm605_vm2 = vcmp.lt.s32.totalorder %v603_v7, 24 }
   0xf   : > { %s1186_s29 = sshll.u32 %s1347_s24, 1 }
  0x10   : > { %p485_p5 = scmp.lt.s32.totalorder %s1186_s29, 2  ;;  %s1193_s9 = scalar_lea.vmem %s1339_s7, %s1186_s29 }
  0x11   : > { %595 = vst.msk [vmem:[%s1193_s9] sm:$0x3] %vm1180_vm0, %v1120_v5  ;;  %s1267_s30 = scalar_lea.vmem %s1338_s6, %s1186_s29 }
  0x12   : > { %s486_s10 = scalar_select %p485_p5, %s1186_s29, 2  ;;  %594 = vst.msk [vmem:[%s1267_s30] sm:$0x3] %vm1180_vm0, %v1120_v5 }
  0x14   : > { %s1058_s11 = sshll.u32 %s486_s10, 4 }
  0x15   : > { %s535_s14 = scalar_lea.vmem %s1334_s2, %s1058_s11  ;;  %s558_s17 = scalar_lea.vmem %s1335_s3, %s1058_s11 }
  0x16   : > { %v626_v8 = vld [vmem:[%s535_s14] sm:$0xff]  ;;  %v627_v9 = vld [vmem:[%s535_s14 + $0x8] sm:$0xff]  ;;  %s489_s20 = scalar_lea.vmem %s1332_s0, %s1058_s11  ;;  %s512_s23 = scalar_lea.vmem %s1333_s1, %s1058_s11  ;;  %v628_v18 = vld [vmem:[%s535_s14 + $0x10] sm:$0xff] }
  0x17   : > { %v630_v10 = vld [vmem:[%s558_s17] sm:$0xff]  ;;  %v631_v11 = vld [vmem:[%s558_s17 + $0x8] sm:$0xff]  ;;  %v629_v22 = vld [vmem:[%s535_s14 + $0x18] sm:$0xff]  ;;  %s1277_s11 = scalar_lea.vmem %s1336_s4, %s1186_s29 }
  0x18   : > { %v634_v12 = vsub.f32 %v626_v8, %v630_v10  ;;  %v606_v13 = vld [vmem:[%s489_s20] sm:$0xff]  ;;  %v607_v14 = vld [vmem:[%s489_s20 + $0x8] sm:$0xff]  ;;  %v635_v15 = vsub.f32 %v627_v9, %v631_v11  ;;  %v632_v23 = vld [vmem:[%s558_s17 + $0x10] sm:$0xff]  ;;  %v1121_v8 = vmov 1966171168  }
  0x19   : > { %v610_v16 = vld [vmem:[%s512_s23] sm:$0xff]  ;;  %v611_v17 = vld [vmem:[%s512_s23 + $0x8] sm:$0xff]  ;;  %v633_v24 = vld [vmem:[%s558_s17 + $0x18] sm:$0xff]  ;;  %v636_v27 = vsub.f32 %v628_v18, %v632_v23  ;;  %v703_v9 = vunpack.c.l.s4 %v1121_v8  ;;  %592 = vst.msk [vmem:[%s1277_s11] sm:$0x3] %vm1180_vm0, %v1120_v5 }
  0x1a   : > { %v638_v19 = vsel %vm604_vm1, %v634_v12, 0.0  ;;  %v614_v20 = vsub.f32 %v606_v13, %v610_v16  ;;  %v615_v21 = vsub.f32 %v607_v14, %v611_v17  ;;  %v639_v25 = vsel %vm604_vm1, %v635_v15, 0.0  ;;  %v608_v29 = vld [vmem:[%s489_s20 + $0x10] sm:$0xff]  ;;  %v609_v34 = vld [vmem:[%s489_s20 + $0x18] sm:$0xff]  ;;  %v805_v23 = vld [vmem:[%s1193_s9] sm:$0x3] }
  0x1b   : > { %v1216_v26 = vmul.f32 %v638_v19, %v638_v19  ;;  %v637_v28 = vsub.f32 %v629_v22, %v633_v24  ;;  %v612_v30 = vld [vmem:[%s512_s23 + $0x10] sm:$0xff]  ;;  %v1218_v31 = vmul.f32 %v639_v25, %v639_v25  ;;  %v613_v35 = vld [vmem:[%s512_s23 + $0x18] sm:$0xff]  ;;  %v640_v44 = vsel %vm605_vm2, %v636_v27, 0.0 }
  0x1c   : > { %v622_v32 = vsel %vm604_vm1, %v614_v20, 0.0  ;;  %v623_v33 = vsel %vm604_vm1, %v615_v21, 0.0  ;;  %v616_v36 = vsub.f32 %v608_v29, %v612_v30  ;;  %v1236_v47 = vmul.f32 %v640_v44, %v640_v44 }
  0x1d   : > { %v1222_v37 = vmul.f32 %v622_v32, %v622_v32  ;;  %v1224_v38 = vmul.f32 %v623_v33, %v623_v33  ;;  %v1226_v39 = vmul.f32 %v638_v19, %v622_v32  ;;  %v1228_v40 = vmul.f32 %v639_v25, %v623_v33 }
  0x1e   : > { %v660_v41 = vadd.f32 %v1218_v31, %v1216_v26  ;;  %v674_v42 = vsub.f32 %v622_v32, %v638_v19  ;;  %v675_v43 = vsub.f32 %v623_v33, %v639_v25  ;;  %v641_v46 = vsel %vm605_vm2, %v637_v28, 0.0 }
  0x1f   : > { %v654_v45 = vadd.f32 %v1224_v38, %v1222_v37  ;;  %v617_v48 = vsub.f32 %v609_v34, %v613_v35  ;;  %v1238_v51 = vmul.f32 %v641_v46, %v641_v46  ;;  %v624_v52 = vsel %vm605_vm2, %v616_v36, 0.0 }
  0x20   : > { %661 = vadd.xlane.f32.xlu1 %v660_v41  ;;  %v806_v49 = vmul.f32 %v674_v42, %v674_v42  ;;  %v807_v50 = vmul.f32 %v675_v43, %v675_v43  ;;  %v1242_v54 = vmul.f32 %v624_v52, %v624_v52  ;;  %v1244_v55 = vmul.f32 %v640_v44, %v624_v52 }
  0x21   : > { %655 = vadd.xlane.f32.xlu0 %v654_v45  ;;  %v625_v53 = vsel %vm605_vm2, %v617_v48, 0.0  ;;  %v676_v56 = vsub.f32 %v624_v52, %v640_v44  ;;  %v663_v57 = vadd.f32 %v1238_v51, %v1236_v47  ;;  %v704_v14 = vunpack.c.0.s8 %v703_v9 }
  0x22   : > { %v1248_v58 = vmul.f32 %v625_v53, %v625_v53  ;;  %v1250_v59 = vmul.f32 %v641_v46, %v625_v53  ;;  %v677_v60 = vsub.f32 %v625_v53, %v641_v46 }
  0x23   : > { %v808_v61 = vmul.f32 %v676_v56, %v676_v56  ;;  %v1255_v19 = vsub.s32 %v704_v14, %v1184_v2 }
  0x24   : > { %664 = vadd.xlane.f32.xlu1 %v663_v57  ;;  %v657_v62 = vadd.f32 %v1248_v58, %v1242_v54  ;;  %v809_v63 = vmul.f32 %v677_v60, %v677_v60 }
  0x25   : > { %v810_v0 = vadd.f32 %v808_v61, %v806_v49 }
  0x26   : > { %v817_v3 = vadd.f32 %v809_v63, %v807_v50  ;;  %658 = vadd.xlane.f32.xlu0 %v657_v62 }
  0x27   : > { %v811_v4 = vrot.slane %v810_v0, 4 }
  0x28   : > { %v818_v6 = vrot.slane %v817_v3, 4 }
  0x29   : > { %v812_v7 = vadd.f32 %v811_v4, %v810_v0 }
  0x2a   : > { %v819_v10 = vadd.f32 %v818_v6, %v817_v3 }
  0x2b   : > { %v813_v11 = vrot.slane %v812_v7, 2 }
  0x2c   : > { %v820_v12 = vrot.slane %v819_v10, 2 }
  0x2d   : > { %v814_v13 = vadd.f32 %v813_v11, %v812_v7 }
  0x2e   : > { %v821_v15 = vadd.f32 %v820_v12, %v819_v10 }
  0x2f   : > { %v815_v16 = vrot.slane %v814_v13, 1 }
  0x30   : > { %v822_v17 = vrot.slane %v821_v15, 1 }
  0x31   : > { %v816_v18 = vadd.f32 %v815_v16, %v814_v13 }
  0x32   : > { %v823_v20 = vadd.f32 %v822_v17, %v821_v15 }
  0x34   : > { %v826_v21 = vcombine.low %v816_v18, %v823_v20 }
  0x36   : > { %v833_v22 = vrot.slane %v826_v21, %v1255_v19 }
  0x38   : > { %v840_v24 = vrot.slane %v833_v22, %v1255_v19 }
  0x3a   : > { %v842_v25 = vadd.f32 %v840_v24, %v805_v23 }
  0x3c   : > { %843 = vst.msk [vmem:[%s1193_s9] sm:$0x3] %vm1180_vm0, %v842_v25  ;;  %s1283_s9 = scalar_lea.vmem %s1337_s5, %s1186_s29 }
  0x3d   : > { %593 = vst.msk [vmem:[%s1283_s9] sm:$0x3] %vm1180_vm0, %v1120_v5 }
  0xad   : > { %v662_v2 = vpop.xlane.xlu1 %661 }
  0xae   : > { %v670_v27 = vmax.f32 %v662_v2, 1e-24  ;;  %v656_v28 = vpop.xlane.xlu0 %655 }
  0xaf   : > { %v666_v29 = vmax.f32 %v656_v28, 1e-24 }
  0xb0   : > { %1088 = vrsqrt.f32 %v670_v27 }
  0xb1   : > { %1090 = vrsqrt.f32 %v666_v29  ;;  %v665_v30 = vpop.xlane.xlu1 %664 }
  0xb2   : > { %v671_v32 = vmax.f32 %v665_v30, 1e-24 }
  0xb3   : > { %v659_v33 = vpop.xlane.xlu0 %658 }
  0xb4   : > { %1092 = vrsqrt.f32 %v671_v32  ;;  %v667_v34 = vmax.f32 %v659_v33, 1e-24 }
  0xb6   : > { %1094 = vrsqrt.f32 %v667_v34 }
  0xba   : > { %v1089_v35 = vpop.eup %1088 }
  0xbb   : > { %v1091_v36 = vpop.eup %1090  ;;  %v765_v41 = vmul.f32 %v1089_v35, %v1089_v35 }
  0xbc   : > { %v679_v43 = vmul.f32 %v1091_v36, %v1089_v35  ;;  %v724_v48 = vmul.f32 %v1091_v36, %v1091_v36 }
  0xbd   : > { %v767_v5 = vmul.f32 %v765_v41, %v1216_v26  ;;  %v768_v46 = vmul.f32 %v765_v41, %v1218_v31 }
  0xbe   : > { %v1093_v42 = vpop.eup %1092  ;;  %v681_v56 = vmul.f32 %v679_v43, %v1226_v39  ;;  %v682_v57 = vmul.f32 %v679_v43, %v1228_v40  ;;  %v726_v26 = vmul.f32 %v724_v48, %v1222_v37  ;;  %v727_v31 = vmul.f32 %v724_v48, %v1224_v38  ;;  %v678_v48 = vld [vmem:[%s1277_s11] sm:$0x3] }
  0xbf   : > { %v766_v44 = vmul.f32 %v1093_v42, %v1093_v42 }
  0xc0   : > { %v1095_v45 = vpop.eup %1094 }
  0xc1   : > { %v769_v49 = vmul.f32 %v766_v44, %v1236_v47  ;;  %v770_v50 = vmul.f32 %v766_v44, %v1238_v51  ;;  %v680_v52 = vmul.f32 %v1095_v45, %v1093_v42  ;;  %v725_v53 = vmul.f32 %v1095_v45, %v1095_v45  ;;  %v764_v44 = vld [vmem:[%s1267_s30] sm:$0x3] }
  0xc3   : > { %v771_v60 = vadd.f32 %v769_v49, %v767_v5  ;;  %v778_v61 = vadd.f32 %v770_v50, %v768_v46  ;;  %v683_v62 = vmul.f32 %v680_v52, %v1244_v55  ;;  %v684_v63 = vmul.f32 %v680_v52, %v1250_v59  ;;  %v723_v52 = vld [vmem:[%s1283_s9] sm:$0x3] }
  0xc4   : > { %v728_v47 = vmul.f32 %v725_v53, %v1242_v54  ;;  %v729_v51 = vmul.f32 %v725_v53, %v1248_v58 }
  0xc5   : > { %v772_v0 = vrot.slane %v771_v60, 4  ;;  %v779_v3 = vrot.slane %v778_v61, 4  ;;  %v685_v4 = vadd.f32 %v683_v62, %v681_v56  ;;  %v692_v39 = vadd.f32 %v684_v63, %v682_v57 }
  0xc6   : > { %v730_v6 = vadd.f32 %v728_v47, %v726_v26  ;;  %v737_v40 = vadd.f32 %v729_v51, %v727_v31 }
  0xc7   : > { %v773_v7 = vadd.f32 %v772_v0, %v771_v60  ;;  %v780_v8 = vadd.f32 %v779_v3, %v778_v61  ;;  %v686_v9 = vrot.slane %v685_v4, 4  ;;  %v693_v55 = vrot.slane %v692_v39, 4 }
  0xc8   : > { %v731_v10 = vrot.slane %v730_v6, 4  ;;  %v738_v59 = vrot.slane %v737_v40, 4 }
  0xc9   : > { %v774_v11 = vrot.slane %v773_v7, 2  ;;  %v781_v37 = vrot.slane %v780_v8, 2  ;;  %v687_v12 = vadd.f32 %v686_v9, %v685_v4  ;;  %v694_v38 = vadd.f32 %v693_v55, %v692_v39 }
  0xca   : > { %v732_v13 = vadd.f32 %v731_v10, %v730_v6  ;;  %v739_v54 = vadd.f32 %v738_v59, %v737_v40 }
  0xcb   : > { %v775_v14 = vadd.f32 %v774_v11, %v773_v7  ;;  %v782_v58 = vadd.f32 %v781_v37, %v780_v8  ;;  %v688_v15 = vrot.slane %v687_v12, 2  ;;  %v695_v16 = vrot.slane %v694_v38, 2 }
  0xcc   : > { %v733_v17 = vrot.slane %v732_v13, 2  ;;  %v740_v18 = vrot.slane %v739_v54, 2 }
  0xcd   : > { %v776_v20 = vrot.slane %v775_v14, 1  ;;  %v783_v21 = vrot.slane %v782_v58, 1  ;;  %v689_v22 = vadd.f32 %v688_v15, %v687_v12  ;;  %v696_v23 = vadd.f32 %v695_v16, %v694_v38 }
  0xce   : > { %v734_v24 = vadd.f32 %v733_v17, %v732_v13  ;;  %v741_v25 = vadd.f32 %v740_v18, %v739_v54 }
  0xcf   : > { %v777_v2 = vadd.f32 %v776_v20, %v775_v14  ;;  %v784_v27 = vadd.f32 %v783_v21, %v782_v58  ;;  %v690_v28 = vrot.slane %v689_v22, 1  ;;  %v697_v29 = vrot.slane %v696_v23, 1 }
  0xd0   : > { %v735_v30 = vrot.slane %v734_v24, 1  ;;  %v742_v32 = vrot.slane %v741_v25, 1 }
  0xd1   : > { %v787_v33 = vcombine.low %v777_v2, %v784_v27  ;;  %v691_v34 = vadd.f32 %v690_v28, %v689_v22  ;;  %v698_v35 = vadd.f32 %v697_v29, %v696_v23 }
  0xd2   : > { %v736_v36 = vadd.f32 %v735_v30, %v734_v24  ;;  %v743_v41 = vadd.f32 %v742_v32, %v741_v25 }
  0xd3   : > { %v794_v42 = vrot.slane %v787_v33, %v1255_v19  ;;  %v701_v43 = vcombine.low %v691_v34, %v698_v35 }
  0xd4   : > { %v746_v45 = vcombine.low %v736_v36, %v743_v41 }
  0xd5   : > { %v801_v5 = vrot.slane %v794_v42, %v1255_v19  ;;  %v708_v46 = vrot.slane %v701_v43, %v1255_v19 }
  0xd6   : > { %v753_v49 = vrot.slane %v746_v45, %v1255_v19 }
  0xd7   : > { %v803_v50 = vadd.f32 %v801_v5, %v764_v44  ;;  %v715_v53 = vrot.slane %v708_v46, %v1255_v19 }
  0xd8   : > { %v760_v56 = vrot.slane %v753_v49, %v1255_v19 }
  0xd9   : > { %804 = vst.msk [vmem:[%s1267_s30] sm:$0x3] %vm1180_vm0, %v803_v50  ;;  %v717_v57 = vadd.f32 %v715_v53, %v678_v48 }
  0xda   : > { %v762_v60 = vadd.f32 %v760_v56, %v723_v52 }
  0xdb   : > { %722 = vst.msk [vmem:[%s1277_s11] sm:$0x3] %vm1180_vm0, %v717_v57 }
  0xdc   : > { %763 = vst.msk [vmem:[%s1283_s9] sm:$0x3] %vm1180_vm0, %v762_v60 }
  0xdd PF: > { %s18_s26 = sadd.s32 1, %s1118_s26   ;;  %s1342_s24 = smov %s1114_s25 }
  0xde   : > { %p15_p6 = scmp.ge.s32.totalorder %s18_s26, 4   ;;  %s1343_s25 = smov %s1345_s27 }
  0xe0   :  { %17 = sbr.rel (!%p15_p6) target bundleno = 2 (0x2), region = 115 }

</bundles_post_ra>
